<compile_context>
chip_gen: v7x
topology: tpu7x:2x2x1
jax: 0.10.0
libtpu: 0.0.40
codegen_flags: <defaults>
</compile_context>

<pallas_src>
import jax
import jax.numpy as jnp
from jax.experimental import pallas as pl
from jax.experimental.pallas import tpu as pltpu

BN_EPS = 1e-5


# ------------------------------ parameters ---------------------------------
def make_params(key, patch_settings, embedding_size):
    """Deterministic Conv1d + BatchNorm1d(eval) parameters for every layer."""
    layers = []
    for i, (k, s, p, c_in) in enumerate(patch_settings):
        c_out = (patch_settings[i + 1][3] if i + 1 < len(patch_settings)
                 else embedding_size)
        key, kw, kb, kg, kbe, km, kv = jax.random.split(key, 7)
        layers.append(dict(
            kernel_size=k, stride=s, padding=p, c_in=c_in, c_out=c_out,
            weight=0.2 * jax.random.normal(kw, (c_out, c_in, k), jnp.float32),
            bias=0.1 * jax.random.normal(kb, (c_out,), jnp.float32),
            gamma=1.0 + 0.1 * jax.random.normal(kg, (c_out,), jnp.float32),
            beta=0.1 * jax.random.normal(kbe, (c_out,), jnp.float32),
            running_mean=0.1 * jax.random.normal(km, (c_out,), jnp.float32),
            running_var=0.5 + jax.random.uniform(kv, (c_out,), jnp.float32),
        ))
    return layers


def fold_params(layers):
    """Fold Conv1d bias + BatchNorm1d(eval) into one (k*C_in, C_out) matrix and
    a (1, C_out) bias row per layer -- done once, off the forward hot path."""
    geoms, w_mats, bias_rows = [], [], []
    for lp in layers:
        k, s, p = lp["kernel_size"], lp["stride"], lp["padding"]
        c_in, c_out = lp["c_in"], lp["c_out"]
        # Kernel taps index rows t*C_in:(t+1)*C_in -> tap-major, channel-minor.
        w_mat = jnp.transpose(lp["weight"], (2, 1, 0)).reshape(k * c_in, c_out)
        scale = lp["gamma"] / jnp.sqrt(lp["running_var"] + BN_EPS)
        w_mat = (w_mat * scale[None, :]).astype(jnp.float32)
        bias = ((lp["bias"] - lp["running_mean"]) * scale
                + lp["beta"]).astype(jnp.float32)
        geoms.append((k, s, p, c_in, c_out))
        w_mats.append(w_mat)
        bias_rows.append(bias.reshape(1, c_out))
    return tuple(geoms), tuple(w_mats), tuple(bias_rows)


# ----------------------------- fused kernel --------------------------------
def _make_fused_kernel(meta):
    """meta: per layer (k, s, p, c_in, c_out, l_in, l_out)."""
    n = len(meta)

    def kernel(*refs):
        x_ref = refs[0]                       # (Lp0, C0) padded layer-0 input
        w_refs = refs[1:1 + n]                # (k*C_in, C_out) folded weights
        b_refs = refs[1 + n:1 + 2 * n]        # (1, C_out)      folded biases
        out_ref = refs[1 + 2 * n]             # (L_fin, C_fin)  final output
        act_refs = refs[2 + 2 * n:]           # VMEM scratch per inner layer

        src = x_ref                           # padded input of current layer
        for li, (k, s, p, c_in, c_out, l_in, l_out) in enumerate(meta):
            w_ref, b_ref = w_refs[li], b_refs[li]
            acc = None
            # In-kernel im2col: one strided row window + one matmul per tap.
            for t in range(k):
                rows = pl.ds(t, l_out, stride=s) if s > 1 else pl.ds(t, l_out)
                x_t = src[rows, :]                          # (l_out, c_in)
                w_t = w_ref[t * c_in:(t + 1) * c_in, :]     # (c_in, c_out)
                d = jnp.dot(x_t, w_t, preferred_element_type=jnp.float32)
                acc = d if acc is None else acc + d
            y = jnp.maximum(acc + b_ref[...], 0.0)          # folded BN + ReLU

            if li == n - 1:
                out_ref[...] = y.astype(out_ref.dtype)
            else:
                p_nxt = meta[li + 1][2]
                nxt = act_refs[li]            # (l_out + 2*p_nxt, c_out) scratch
                if p_nxt > 0:
                    nxt[...] = jnp.zeros_like(nxt)   # conv zero-padding rows
                nxt[pl.ds(p_nxt, l_out), :] = y
                src = nxt                     # next layer reads from VMEM

    return kernel


def make_forward(geoms):
    """Build a jitted forward over static layer geometry (k, s, p, c_in, c_out)."""
    n = len(geoms)

    @jax.jit
    def forward(x_ncl, w_mats, bias_rows):
        B, _, L0 = x_ncl.shape
        # Per-layer lengths (static under jit).
        meta, l_in = [], L0
        for (k, s, p, c_in, c_out) in geoms:
            l_out = (l_in + 2 * p - k) // s + 1
            meta.append((k, s, p, c_in, c_out, l_in, l_out))
            l_in = l_out
        meta = tuple(meta)
        p0, c_in0 = meta[0][2], meta[0][3]
        c_fin, l_fin = meta[-1][4], meta[-1][6]
        lp0 = L0 + 2 * p0

        # Only HBM-side prep: NCL -> NLC (channels on lanes) + layer-0 conv
        # zero padding.  No K/stride-expanded im2col array is materialized.
        x = jnp.transpose(x_ncl, (0, 2, 1))
        if p0 > 0:
            x = jnp.pad(x, ((0, 0), (p0, p0), (0, 0)))

        in_specs = [pl.BlockSpec((None, lp0, c_in0), lambda i: (i, 0, 0))]
        in_specs += [pl.BlockSpec((k * c_in, c_out), lambda i: (0, 0))
                     for (k, _s, _p, c_in, c_out, _li, _lo) in meta]
        in_specs += [pl.BlockSpec((1, c_out), lambda i: (0, 0))
                     for (_k, _s, _p, _ci, c_out, _li, _lo) in meta]

        scratch_shapes = [
            pltpu.VMEM((meta[li][6] + 2 * meta[li + 1][2], meta[li][4]),
                       jnp.float32)
            for li in range(n - 1)
        ]

        out = pl.pallas_call(
            _make_fused_kernel(meta),
            out_shape=jax.ShapeDtypeStruct((B, l_fin, c_fin), jnp.float32),
            grid=(B,),
            in_specs=in_specs,
            out_specs=pl.BlockSpec((None, l_fin, c_fin), lambda i: (i, 0, 0)),
            scratch_shapes=scratch_shapes,
            compiler_params=pltpu.CompilerParams(
                dimension_semantics=("parallel",)),   # megacore on v7x
        )(x, *w_mats, *bias_rows)
        # Rearrange('batch channel length -> batch length channel') == the NLC
        # layout the kernel already produced.
        return out

    return forward


# Pure-JAX f32 reference (matches PyTorch Conv1d + BatchNorm1d.eval() + ReLU).
def reference_forward(x_ncl, layers):
    x = x_ncl
    for lp in layers:
        z = jax.lax.conv_general_dilated(
            x, lp["weight"], window_strides=(lp["stride"],),
            padding=[(lp["padding"], lp["padding"])],
            dimension_numbers=("NCH", "OIH", "NCH"))
        z = z + lp["bias"][None, :, None]
        s = lp["gamma"] / jnp.sqrt(lp["running_var"] + BN_EPS)
        z = ((z - lp["running_mean"][None, :, None]) * s[None, :, None]
             + lp["beta"][None, :, None])
        x = jnp.maximum(z, 0.0)
    return jnp.transpose(x, (0, 2, 1))


if __name__ == "__main__":
    # patch_setting = (kernel_size, stride, padding, input_channel)
    patch_settings = [(3, 2, 1, 4), (3, 2, 1, 8)]
    embedding_size = 32
    B, C, L = 2, 4, 16

    key = jax.random.PRNGKey(0)
    key, kx = jax.random.split(key)
    x = jax.random.normal(kx, (B, C, L), jnp.float32)   # NCL, like PyTorch
    layers = make_params(key, patch_settings, embedding_size)

    geoms, w_mats, bias_rows = fold_params(layers)      # hoisted, once
    forward = make_forward(geoms)

    out = jax.block_until_ready(forward(x, w_mats, bias_rows))

    ref = reference_forward(x, layers)
    assert out.shape == (B, L // 4, embedding_size), out.shape
    # f32 end-to-end; tolerance covers default MXU matmul precision.
    assert jnp.allclose(out, ref, atol=2e-2, rtol=2e-2), "mismatch vs reference"

    print("KERNEL_OK")
</pallas_src>

<mosaic_0001>
module attributes {stable_mosaic.version = 11 : i64} {
  func.func @kernel(%arg0: i32, %arg1: memref<1x18x4xf32, #tpu.memory_space<vmem>>, %arg2: memref<12x8xf32, #tpu.memory_space<vmem>>, %arg3: memref<24x32xf32, #tpu.memory_space<vmem>>, %arg4: memref<1x8xf32, #tpu.memory_space<vmem>>, %arg5: memref<1x32xf32, #tpu.memory_space<vmem>>, %arg6: memref<1x4x32xf32, #tpu.memory_space<vmem>>, %arg7: memref<10x8xf32, #tpu.memory_space<vmem>>) attributes {dimension_semantics = [#tpu.dimension_semantics<parallel>], iteration_bounds = array<i64: 2>, scalar_prefetch = 0 : i64, scratch_operands = 1 : i64, tpu.core_type = #tpu.core_type<tc>, window_params = [{transform_indices = @transform_0, window_bounds = array<i64: 1, 18, 4>}, {pipeline_mode = #tpu.pipeline_mode<synchronous>, transform_indices = @transform_1, window_bounds = array<i64: 12, 8>}, {pipeline_mode = #tpu.pipeline_mode<synchronous>, transform_indices = @transform_2, window_bounds = array<i64: 24, 32>}, {pipeline_mode = #tpu.pipeline_mode<synchronous>, transform_indices = @transform_3, window_bounds = array<i64: 1, 8>}, {pipeline_mode = #tpu.pipeline_mode<synchronous>, transform_indices = @transform_4, window_bounds = array<i64: 1, 32>}, {transform_indices = @transform_5, window_bounds = array<i64: 1, 4, 32>}]} {
    %c0 = arith.constant 0 : index
    %c0_0 = arith.constant 0 : index
    %c0_1 = arith.constant 0 : index
    %0 = tpu.strided_load %arg1[%c0, %c0_0, %c0_1] {strides = array<i32: 1, 2, 1>} : memref<1x18x4xf32, #tpu.memory_space<vmem>>, vector<1x8x4xf32>
    %1 = vector.shape_cast %0 : vector<1x8x4xf32> to vector<8x4xf32>
    %c0_2 = arith.constant 0 : index
    %c0_3 = arith.constant 0 : index
    %2 = vector.load %arg2[%c0_2, %c0_3] : memref<12x8xf32, #tpu.memory_space<vmem>>, vector<4x8xf32>
    %cst = arith.constant dense<0.000000e+00> : vector<8x8xf32>
    %3 = tpu.matmul %1, %2, %cst {dimension_numbers = #tpu.dot_dimension_numbers<[1], [0], [0], [1], [0, 0, 1, 1], [], []>} : vector<8x4xf32>, vector<4x8xf32>, vector<8x8xf32> -> vector<8x8xf32>
    %c0_4 = arith.constant 0 : index
    %c1 = arith.constant 1 : index
    %c0_5 = arith.constant 0 : index
    %4 = tpu.strided_load %arg1[%c0_4, %c1, %c0_5] {strides = array<i32: 1, 2, 1>} : memref<1x18x4xf32, #tpu.memory_space<vmem>>, vector<1x8x4xf32>
    %5 = vector.shape_cast %4 : vector<1x8x4xf32> to vector<8x4xf32>
    %c4 = arith.constant 4 : index
    %c0_6 = arith.constant 0 : index
    %6 = vector.load %arg2[%c4, %c0_6] : memref<12x8xf32, #tpu.memory_space<vmem>>, vector<4x8xf32>
    %cst_7 = arith.constant dense<0.000000e+00> : vector<8x8xf32>
    %7 = tpu.matmul %5, %6, %cst_7 {dimension_numbers = #tpu.dot_dimension_numbers<[1], [0], [0], [1], [0, 0, 1, 1], [], []>} : vector<8x4xf32>, vector<4x8xf32>, vector<8x8xf32> -> vector<8x8xf32>
    %8 = arith.addf %3, %7 : vector<8x8xf32>
    %c0_8 = arith.constant 0 : index
    %c2 = arith.constant 2 : index
    %c0_9 = arith.constant 0 : index
    %9 = tpu.strided_load %arg1[%c0_8, %c2, %c0_9] {strides = array<i32: 1, 2, 1>} : memref<1x18x4xf32, #tpu.memory_space<vmem>>, vector<1x8x4xf32>
    %10 = vector.shape_cast %9 : vector<1x8x4xf32> to vector<8x4xf32>
    %c8 = arith.constant 8 : index
    %c0_10 = arith.constant 0 : index
    %11 = vector.load %arg2[%c8, %c0_10] : memref<12x8xf32, #tpu.memory_space<vmem>>, vector<4x8xf32>
    %cst_11 = arith.constant dense<0.000000e+00> : vector<8x8xf32>
    %12 = tpu.matmul %10, %11, %cst_11 {dimension_numbers = #tpu.dot_dimension_numbers<[1], [0], [0], [1], [0, 0, 1, 1], [], []>} : vector<8x4xf32>, vector<4x8xf32>, vector<8x8xf32> -> vector<8x8xf32>
    %13 = arith.addf %8, %12 : vector<8x8xf32>
    %c0_12 = arith.constant 0 : index
    %c0_13 = arith.constant 0 : index
    %14 = vector.load %arg4[%c0_12, %c0_13] : memref<1x8xf32, #tpu.memory_space<vmem>>, vector<1x8xf32>
    %15 = vector.broadcast %14 : vector<1x8xf32> to vector<8x8xf32>
    %16 = arith.addf %13, %15 : vector<8x8xf32>
    %cst_14 = arith.constant 0.000000e+00 : f32
    %17 = vector.broadcast %cst_14 : f32 to vector<8x8xf32>
    %18 = arith.maximumf %16, %17 : vector<8x8xf32>
    %cst_15 = arith.constant 0.000000e+00 : f32
    %19 = vector.broadcast %cst_15 : f32 to vector<10x8xf32>
    %c0_16 = arith.constant 0 : index
    %c0_17 = arith.constant 0 : index
    %20 = vector.load %arg7[%c0_16, %c0_17] : memref<10x8xf32, #tpu.memory_space<vmem>>, vector<10x8xf32>
    tpu.vector_store %arg7[%c0_16, %c0_17], %19 {strides = array<i32>} : memref<10x8xf32, #tpu.memory_space<vmem>>, vector<10x8xf32>,
    %c1_18 = arith.constant 1 : index
    %c0_19 = arith.constant 0 : index
    %21 = vector.load %arg7[%c1_18, %c0_19] : memref<10x8xf32, #tpu.memory_space<vmem>>, vector<8x8xf32>
    tpu.vector_store %arg7[%c1_18, %c0_19], %18 {strides = array<i32>} : memref<10x8xf32, #tpu.memory_space<vmem>>, vector<8x8xf32>,
    %c0_20 = arith.constant 0 : index
    %c0_21 = arith.constant 0 : index
    %22 = tpu.strided_load %arg7[%c0_20, %c0_21] {strides = array<i32: 2, 1>} : memref<10x8xf32, #tpu.memory_space<vmem>>, vector<4x8xf32>
    %c0_22 = arith.constant 0 : index
    %c0_23 = arith.constant 0 : index
    %23 = vector.load %arg3[%c0_22, %c0_23] : memref<24x32xf32, #tpu.memory_space<vmem>>, vector<8x32xf32>
    %cst_24 = arith.constant dense<0.000000e+00> : vector<4x32xf32>
    %24 = tpu.matmul %22, %23, %cst_24 {dimension_numbers = #tpu.dot_dimension_numbers<[1], [0], [0], [1], [0, 0, 1, 1], [], []>} : vector<4x8xf32>, vector<8x32xf32>, vector<4x32xf32> -> vector<4x32xf32>
    %c1_25 = arith.constant 1 : index
    %c0_26 = arith.constant 0 : index
    %25 = tpu.strided_load %arg7[%c1_25, %c0_26] {strides = array<i32: 2, 1>} : memref<10x8xf32, #tpu.memory_space<vmem>>, vector<4x8xf32>
    %c8_27 = arith.constant 8 : index
    %c0_28 = arith.constant 0 : index
    %26 = vector.load %arg3[%c8_27, %c0_28] : memref<24x32xf32, #tpu.memory_space<vmem>>, vector<8x32xf32>
    %cst_29 = arith.constant dense<0.000000e+00> : vector<4x32xf32>
    %27 = tpu.matmul %25, %26, %cst_29 {dimension_numbers = #tpu.dot_dimension_numbers<[1], [0], [0], [1], [0, 0, 1, 1], [], []>} : vector<4x8xf32>, vector<8x32xf32>, vector<4x32xf32> -> vector<4x32xf32>
    %28 = arith.addf %24, %27 : vector<4x32xf32>
    %c2_30 = arith.constant 2 : index
    %c0_31 = arith.constant 0 : index
    %29 = tpu.strided_load %arg7[%c2_30, %c0_31] {strides = array<i32: 2, 1>} : memref<10x8xf32, #tpu.memory_space<vmem>>, vector<4x8xf32>
    %c16 = arith.constant 16 : index
    %c0_32 = arith.constant 0 : index
    %30 = vector.load %arg3[%c16, %c0_32] : memref<24x32xf32, #tpu.memory_space<vmem>>, vector<8x32xf32>
    %cst_33 = arith.constant dense<0.000000e+00> : vector<4x32xf32>
    %31 = tpu.matmul %29, %30, %cst_33 {dimension_numbers = #tpu.dot_dimension_numbers<[1], [0], [0], [1], [0, 0, 1, 1], [], []>} : vector<4x8xf32>, vector<8x32xf32>, vector<4x32xf32> -> vector<4x32xf32>
    %32 = arith.addf %28, %31 : vector<4x32xf32>
    %c0_34 = arith.constant 0 : index
    %c0_35 = arith.constant 0 : index
    %33 = vector.load %arg5[%c0_34, %c0_35] : memref<1x32xf32, #tpu.memory_space<vmem>>, vector<1x32xf32>
    %34 = vector.broadcast %33 : vector<1x32xf32> to vector<4x32xf32>
    %35 = arith.addf %32, %34 : vector<4x32xf32>
    %cst_36 = arith.constant 0.000000e+00 : f32
    %36 = vector.broadcast %cst_36 : f32 to vector<4x32xf32>
    %37 = arith.maximumf %35, %36 : vector<4x32xf32>
    %c0_37 = arith.constant 0 : index
    %c0_38 = arith.constant 0 : index
    %c0_39 = arith.constant 0 : index
    %38 = vector.load %arg6[%c0_37, %c0_38, %c0_39] : memref<1x4x32xf32, #tpu.memory_space<vmem>>, vector<1x4x32xf32>
    %39 = vector.shape_cast %38 : vector<1x4x32xf32> to vector<4x32xf32>
    %40 = vector.shape_cast %37 : vector<4x32xf32> to vector<1x4x32xf32>
    tpu.vector_store %arg6[%c0_37, %c0_38, %c0_39], %40 {strides = array<i32>} : memref<1x4x32xf32, #tpu.memory_space<vmem>>, vector<1x4x32xf32>,
    return
  }
  func.func @transform_0(%arg0: i32) -> (i32, i32, i32) {
    %c0_i32 = arith.constant 0 : i32
    %c0_i32_0 = arith.constant 0 : i32
    %c0_i32_1 = arith.constant 0 : i32
    return %arg0, %c0_i32, %c0_i32_0 : i32, i32, i32
  }
  func.func @transform_1(%arg0: i32) -> (i32, i32) {
    %c0_i32 = arith.constant 0 : i32
    %c0_i32_0 = arith.constant 0 : i32
    %c0_i32_1 = arith.constant 0 : i32
    return %c0_i32, %c0_i32_0 : i32, i32
  }
  func.func @transform_2(%arg0: i32) -> (i32, i32) {
    %c0_i32 = arith.constant 0 : i32
    %c0_i32_0 = arith.constant 0 : i32
    %c0_i32_1 = arith.constant 0 : i32
    return %c0_i32, %c0_i32_0 : i32, i32
  }
  func.func @transform_3(%arg0: i32) -> (i32, i32) {
    %c0_i32 = arith.constant 0 : i32
    %c0_i32_0 = arith.constant 0 : i32
    %c0_i32_1 = arith.constant 0 : i32
    return %c0_i32, %c0_i32_0 : i32, i32
  }
  func.func @transform_4(%arg0: i32) -> (i32, i32) {
    %c0_i32 = arith.constant 0 : i32
    %c0_i32_0 = arith.constant 0 : i32
    %c0_i32_1 = arith.constant 0 : i32
    return %c0_i32, %c0_i32_0 : i32, i32
  }
  func.func @transform_5(%arg0: i32) -> (i32, i32, i32) {
    %c0_i32 = arith.constant 0 : i32
    %c0_i32_0 = arith.constant 0 : i32
    %c0_i32_1 = arith.constant 0 : i32
    return %arg0, %c0_i32, %c0_i32_0 : i32, i32, i32
  }
}

</mosaic_0001>

<bundles_post_ra>
// kernel: forward.1
= control target key start
LH: loop header
LB: loop body
LE: loop exit
PB: predicated region body
PF: predicated region fallthrough
CT: control target
= control target key end

     0   :  { %10 = vsyncpa [#allocation4], 0  ;;  %s1130_s0 = inlined_call_operand.vmem [shape: f32[2,18,4], index: 0, kind: input, shape index: {}]   ;;  %s1131_s1 = inlined_call_operand.vmem [shape: f32[12,8], index: 1, kind: input, shape index: {}]   ;;  %s1132_s2 = inlined_call_operand.vmem [shape: f32[24,32], index: 2, kind: input, shape index: {}]   ;;  %s1133_s3 = inlined_call_operand.vmem [shape: f32[1,8], index: 3, kind: input, shape index: {}]   ;;  %s1134_s4 = inlined_call_operand.vmem [shape: f32[1,32], index: 4, kind: input, shape index: {}]   ;;  %s1135_s5 = inlined_call_operand.hbm [shape: f32[2,4,32], index: 5, kind: output, shape index: {}]  }
   0x1   :  { %12 = vsyncpa [#allocation4 + $0x1], 0  ;;  %s992_s18 = smov 0   ;;  %s994_s19 = smov 0  }
   0x2   :  { %s996_s20 = smov 0   ;;  %s998_s21 = smov 0  }
   0x3 LB: > { %s1013_s22 = sadd.s32 4294967295, %s957_s21   ;;  %s788_s23 = sadd.s32 4294967294, %s957_s21   ;;  %s957_s21 = sphi %s998_s21, %s1141_s21   ;;  %s953_s20 = sphi %s996_s20, %s1140_s20   ;;  %s949_s19 = sphi %s994_s19, %s1139_s19   ;;  %s945_s18 = sphi %s992_s18, %s1138_s18  }
   0x4   : > { %s1017_s24 = sadd.s32 1, %s957_s21   ;;  %s135_s25 = sadd.s32 1, %s953_s20 }
   0x5   : > { %s132_s26 = ssub.s32 %s957_s21, %s1017_s24  ;;  %p145_p0 = scmp.ne.s32.totalorder %s953_s20, %s949_s19 }
   0x6   : > { %p133_p1 = scmp.eq.s32.totalorder %s132_s26, 0  ;;  %p146_p2 = scmp.eq.s32.totalorder %s1013_s22, 1 }
   0x7   : > { %p151_p3 = scmp.ne.s32.totalorder %s949_s19, %s945_s18  ;;  %p152_p4 = scmp.eq.s32.totalorder %s788_s23, 1 }
   0x8   : > { %s1028_s27 = scalar_select %p133_p1, %s953_s20, %s135_s25  }
   0x9   : > { %p1030_p5 = por %p146_p2, %p145_p0  ;;  %p1034_p6 = por %p152_p4, %p151_p3 }
   0xa   : > { %p791_p7 = scmp.ge.s32.totalorder %s957_s21, 1  ;;  %p190_p8 = scmp.lt.s32.totalorder %s957_s21, 3 }
   0xc   : > { %p191_p9 = pnand %p791_p7, %p190_p8 }
   0xd   : > { %v227_v0 = vld [vmem:[%s1131_s1 + $0x4] sm:$0xf] (!%p191_p9)  ;;  %vm232_vm0 = vcmask (!%p191_p9), 1043456   ;;  %p218_p10 = scmp.lt.s32.totalorder (!%p191_p9), %s1013_s22, 1  ;;  %v959_v1 = vmov (!%p191_p9), 0.0   ;;  %vm960_vm1 = vmmov (!%p191_p9), 0  }
   0xe   : > { %194 = sbr.rel (%p191_p9) target bundleno = 493 (0x1ed), region = 40  ;;  %823 = vmatprep.subr.mxu0 (!%p191_p9), %v959_v1  ;;  %828 = vmatprep.subr.mxu1 (!%p191_p9), %v959_v1  ;;  %v224_v2 = vld [vmem:[%s1131_s1] sm:$0xf] (!%p191_p9)  ;;  %vm228_vm2 = vcmask (!%p191_p9), 31744   ;;  %v384_v3 = vld [vmem:[%s1131_s1 + $0x8] sm:$0xf] (!%p191_p9) }
   0xf   : > { %824 = vmatpush3.msk.msra.mxu0 (!%p191_p9), %vm232_vm0, %v227_v0  ;;  %825 = vmatprep.mubr.msk.f32.mxu0 (!%p191_p9), %vm960_vm1, %v959_v1  ;;  %v480_v7 = vld [vmem:[%s1132_s2 + $0x8] sm:$0xff] (!%p191_p9)  ;;  %v477_v8 = vld [vmem:[%s1132_s2] sm:$0xff] (!%p191_p9)  ;;  %vm471_vm3 = vcmask (!%p191_p9), 64512   ;;  %vm473_vm4 = vcmask (!%p191_p9), 58368   ;;  %v629_v20 = vld [vmem:[%s1132_s2 + $0x10] sm:$0xff] (!%p191_p9)  ;;  %s215_s8 = sand.u32 (!%p191_p9), 1, %s949_s19  }
  0x10   : > { %829 = vmatpush3.msk.msra.mxu1 (!%p191_p9), %vm232_vm0, %v224_v2  ;;  %830 = vmatprep.mubr.msk.f32.mxu1 (!%p191_p9), %vm960_vm1, %v959_v1  ;;  %472 = vst.msk [vmem:[#allocation2] sm:$0xff] (!%p191_p9), %vm471_vm3, %v959_v1  ;;  %v802_v15 = vld [vmem:[%s1133_s3] ss:$0 sm:$0xff] (!%p191_p9)  ;;  %s808_s12 = sshll.u32 (!%p191_p9), %s1013_s22, 6  ;;  %vm713_vm5 = vcmask (!%p191_p9), 257024   ;;  %s716_s23 = scalar_lea.sflag (!%p191_p9), [#allocation4], %s215_s8 }
  0x11   : > { %833 = vmatprep.subr.mxu0 (!%p191_p9), %v959_v1  ;;  %838 = vmatprep.subr.mxu1 (!%p191_p9), %v959_v1  ;;  %474 = vst.msk [vmem:[#allocation2 + $0x8] sm:$0x3] (!%p191_p9), %vm473_vm4, %v959_v1  ;;  %v806_v30 = vld [vmem:[%s1134_s4] ss:$0 sm:$0xff] (!%p191_p9)  ;;  %s1088_s17 = scalar_lea.hbm (!%p191_p9), %s1135_s5, %s808_s12 }
  0x15   : > { %s219_s9 = scalar_select %p218_p10, %s1013_s22, 1 }
  0x16   : > { %s961_s22 = smov [#allocation3]  }
  0x17   : > { %s853_s10 = smul.u32 24, %s219_s9  ;;  %s792_s9 = sshll.u32 %s215_s8, 2 }
  0x18   : > { %s899_s26 = sshll.u32 %s961_s22, 4  ;;  %s900_s26 = int_to_ptr.vmem [resolvable:$false] %s899_s26 }
  0x19   : > { %s222_s13 = scalar_lea.vmem %s1130_s0, %s853_s10  ;;  %s901_s30 = scalar_lea.vmem %s900_s26, 128 }
  0x1a   : > { %v794_v4 = vld [vmem:[%s222_s13 + $0x1] ss:$2 sm:$0xff]  ;;  %v223_v5 = vld [vmem:[%s222_s13] ss:$2 sm:$0xff] }
  0x1b   : > { %826 = vmatmul.mubr.msk.f32.vlgmr.msra.gmra.mrb[0].mxu0 %vm228_vm2, %v794_v4  ;;  %831 = vmatmul.mubr.msk.f32.vlgmr.msra.gmra.mrb[0].mxu1 %vm228_vm2, %v223_v5  ;;  %v799_v6 = vld [vmem:[%s222_s13 + $0x2] ss:$2 sm:$0xff]  ;;  %s217_s13 = scalar_lea.vmem [#allocation3], %s792_s9 }
  0x1c   : > { %834 = vmatpush3.msk.msra.mxu0 %vm232_vm0, %v384_v3  ;;  %835 = vmatprep.mubr.msk.f32.mxu0 %vm960_vm1, %v959_v1  ;;  %s729_s14 = sshll.u32 %s217_s13, 4  ;;  %s1090_s14 = int_to_ptr.vmem [resolvable:$true] %s729_s14 }
  0x1d   : > { %843 = vmatprep.subr.mxu0 %v959_v1  ;;  %840 = vmatprep.mubr.msk.f32.mxu1 %vm960_vm1, %v959_v1  ;;  %s895_s25 = scalar_lea.vmem %s1090_s14, 64  ;;  %p902_p0 = scmp.lt.s32.totalorder %s1090_s14, %s900_s26 }
  0x1e   : > { %839 = vmatpush3.msra.mxu1 %v480_v7  ;;  %p896_p11 = scmp.ne.s32.totalorder %s1090_s14, %s895_s25  ;;  %p903_p1 = scmp.lt.s32.totalorder %s901_s30, %s895_s25 }
  0x1f   : > { %836 = vmatmul.mubr.msk.f32.vlgmr.msra.gmra.mrb[2].mxu0 %vm228_vm2, %v799_v6  ;;  %848 = vmatprep.subr.mxu1 %v959_v1 }
  0x20   : > { %845 = vmatprep.mubr.msk.f32.mxu0 %vm960_vm1, %v959_v1  ;;  %844 = vmatpush3.msra.mxu0 %v477_v8  ;;  %p897_p12 = pnand %p896_p11, %p1030_p5  ;;  %p904_p2 = por %p903_p1, %p902_p0 }
  0x22   : > { %p898_p13 = pneg %p897_p12 }
  0x24   : > { %p905_p3 = pnand %p904_p2, %p898_p13 }
  0xee   : > { %v302_v9 = vpop.f32.mrb[0].mxu0  ;;  %v378_v10 = vpop.f32.mrb[0].mxu1 }
  0xef   : > { %v379_v11 = vadd.f32 %v378_v10, %v302_v9  ;;  %v827_v12 = vpop.f32.mrb[1].mxu0  ;;  %v832_v13 = vpop.f32.mrb[1].mxu1 }
  0xf2   : > { %v457_v14 = vpop.f32.mrb[2].mxu0 }
  0xf3   : > { %v461_v16 = vadd.f32 %v457_v14, %v379_v11  ;;  %v837_v17 = vpop.f32.mrb[3].mxu0 }
  0xf5   : > { %v469_v18 = vadd.f32 %v802_v15, %v461_v16 }
  0xf7   : > { %v470_v19 = vmax.f32 %v469_v18, 0.0 }
  0xf9   : > { %475 = vst.msk [vmem:[#allocation2 + $0x1] sm:$0xff] %vm471_vm3, %v470_v19 }
 0x100   : > { %v479_v21 = vld [vmem:[#allocation2 + $0x1] ss:$2 sm:$0xf]  ;;  %v476_v22 = vld [vmem:[#allocation2] ss:$2 sm:$0xf] }
 0x101   : > { %841 = vmatmul.mubr.msk.f32.vlgmr.msra.gmra.mrb[2].mxu1 %vm471_vm3, %v479_v21  ;;  %846 = vmatmul.mubr.msk.f32.vlgmr.msra.gmra.mrb[4].mxu0 %vm471_vm3, %v476_v22  ;;  %v628_v23 = vld [vmem:[#allocation2 + $0x2] ss:$2 sm:$0xf] }
 0x102   : > { %849 = vmatpush3.msra.mxu1 %v629_v20  ;;  %850 = vmatprep.mubr.msk.f32.mxu1 %vm960_vm1, %v959_v1 }
 0x105   : > { %851 = vmatmul.mubr.msk.f32.vlgmr.msra.gmra.mrb[4].mxu1 %vm471_vm3, %v628_v23 }
 0x1d4   : > { %v550_v24 = vpop.f32.mrb[2].mxu1  ;;  %v623_v25 = vpop.f32.mrb[4].mxu0 }
 0x1d5   : > { %v624_v26 = vadd.f32 %v623_v25, %v550_v24  ;;  %v842_v27 = vpop.f32.mrb[3].mxu1  ;;  %v847_v28 = vpop.f32.mrb[5].mxu0 }
 0x1d8   : > { %v699_v29 = vpop.f32.mrb[4].mxu1 }
 0x1d9   : > { %v703_v31 = vadd.f32 %v699_v29, %v624_v26  ;;  %v852_v32 = vpop.f32.mrb[5].mxu1 }
 0x1db   : > { %v711_v33 = vadd.f32 %v806_v30, %v703_v31 }
 0x1dd   : > { %v712_v34 = vmax.f32 %v711_v33, 0.0 }
 0x1df   : > { %714 = vst.msk [vmem:[%s217_s13] sm:$0xf] %vm713_vm5, %v712_v34 }
 0x1e0   : > { %908 = shalt.err (!%p905_p3)
}
 0x1e1   : > { %s909_s6 = scalar_lea.hbm %s1088_s17, 64  ;;  %s913_s9 = scalar_lea.hbm %s1135_s5, 128 }
 0x1e2   : > { %p910_p4 = scmp.ne.s32.totalorder %s1088_s17, %s909_s6  ;;  %p914_p9 = scmp.lt.u32.totalorder %s1088_s17, %s1135_s5 }
 0x1e3   : > { %p915_p10 = scmp.lt.u32.totalorder %s913_s9, %s909_s6  ;;  %p917_p12 = scmp.lt.u32.totalorder %s909_s6, %s1088_s17 }
 0x1e4   : > { %p911_p7 = pnand %p910_p4, %p1030_p5 }
 0x1e5   : > { %p916_p11 = por %p915_p10, %p914_p9 }
 0x1e6   : > { %p912_p8 = pneg %p911_p7 }
 0x1e7   : > { %p918_p13 = por %p917_p12, %p916_p11 }
 0x1e9   : > { %p919_p0 = pnand %p918_p13, %p912_p8 }
 0x1eb   : > { %922 = shalt.err (!%p919_p0)
}
 0x1ec   : > { %854 = dma.vmem_to_hbm [thread:$0]  (%p1030_p5), %s1090_s14, 64, %s1088_s17, %s716_s23  }
 0x1ed PF: > { %p860_p1 = scmp.ge.s32.totalorder %s957_s21, 2  ;;  %s741_s12 = sand.u32 1, %s945_s18  }
 0x1ee   : > { %s742_s13 = scalar_lea.sflag [#allocation4], %s741_s12 }
 0x1ef   : > { %p857_p2 = pnand %p860_p1, %p1034_p6 }
 0x1f1   : > { %940 = dma.done.wait (!%p857_p2), %s742_s13, 64  }
 0x1f2   : > { %942 = vsyncadd (!%p857_p2), %s742_s13, 4294967232  ;;  %p15_p3 = scmp.ge.s32.totalorder %s1017_s24, 4   ;;  %s1138_s18 = smov %s949_s19 }
 0x1f3   : > { %s1139_s19 = smov %s953_s20  ;;  %s1140_s20 = smov %s1028_s27 }
 0x1f4   : > { %s1141_s21 = smov %s1017_s24  ;;  %17 = sbr.rel (!%p15_p3) target bundleno = 3 (0x3), region = 79 }
 0x1fb   :  { %747 = vsyncpa [#allocation4], 1 }
 0x1fc   :  { %749 = vsyncpa [#allocation4 + $0x1], 1 }

</bundles_post_ra>
